<compile_context>
chip_gen: v5e
topology: v5e:2x2
jax: 0.10.0
libtpu: 0.0.40
codegen_flags: <defaults>
</compile_context>

<pallas_src>
import functools

import jax
import jax.numpy as jnp
from jax.experimental import pallas as pl
from jax.experimental.pallas import tpu as pltpu


def _fused_gnn_kernel(adj_ref, dinv_ref, x_ref, w1_ref, b1_ref, w2_ref, b2_ref,
                      out_ref, *, hidden):
    """out = SAGE2( relu( SAGE1(x) ) ), whole problem resident in VMEM.

    adj_ref : (Np, Np)  bf16 unnormalized edge counts (A[i, j] = #edges j->i)
    dinv_ref: (Np, 1)   f32  1/in-degree (0 for isolated / padded nodes)
    x_ref   : (Np, Hp)  bf16 node features, data in lanes [0, hidden)
    w*_ref  : (Hp, Hp)  bf16 packed weight: rows [0,H) = W_l, rows [H,2H) = W_r
    b*_ref  : (1, Hp)   f32  bias of lin_l (lin_r has no bias in SAGEConv)
    out_ref : (Np, Hp)  f32
    """
    hp = x_ref.shape[1]
    adj = adj_ref[...]
    dinv = dinv_ref[...]

    def sage_layer(x_bf16, w_ref, b_ref):
        # Mean aggregation: bf16 x bf16 -> f32 MXU matmul, f32 row scale on VPU.
        aggr = jnp.dot(adj, x_bf16, preferred_element_type=jnp.float32) * dinv
        # Pack [aggr | x] into ONE lane-dense K = Hp bf16 operand:
        #   lanes [0, H) = aggr, lanes [H, 2H) = x, remaining lanes stay zero
        # (x's pad lanes are zero, so the trailing slice carries only x data).
        feats = jnp.concatenate(
            [aggr[:, :hidden].astype(jnp.bfloat16), x_bf16[:, :hp - hidden]],
            axis=1)
        # Single fused neighbor+root contraction: one bf16 MXU pass per layer.
        return jnp.dot(feats, w_ref[...],
                       preferred_element_type=jnp.float32) + b_ref[...]

    h1 = jnp.maximum(sage_layer(x_ref[...], w1_ref, b1_ref), 0.0)
    out_ref[...] = sage_layer(h1.astype(jnp.bfloat16), w2_ref, b2_ref
                              ).astype(out_ref.dtype)


def padded_size(n, multiple=128):
    return ((n + multiple - 1) // multiple) * multiple


def build_count_adjacency(edge_index, num_nodes_padded):
    """Unnormalized dense adjacency (edge counts) + inverse in-degree.

    counts[i, j] = number of edges j -> i   (small ints, exact in bf16)
    dinv[i]      = 1 / sum_j counts[i, j]   (0 for isolated / padded nodes)
    Matches PyG SAGEConv mean aggregation.  Call-invariant for a fixed graph:
    compute once and reuse across forward calls (hoisted out of the hot path).
    """
    src, dst = edge_index[0], edge_index[1]
    counts = jnp.zeros((num_nodes_padded, num_nodes_padded),
                       jnp.float32).at[dst, src].add(1.0)
    deg = counts.sum(axis=1, keepdims=True)
    dinv = jnp.where(deg > 0, 1.0 / jnp.maximum(deg, 1.0), 0.0)
    return counts.astype(jnp.bfloat16), dinv.astype(jnp.float32)


def pack_layer_params(w_l, w_r, b_l, hp):
    """Pack [W_l ; W_r] into one lane-dense (Hp, Hp) bf16 weight.

    Rows [0, H) act on the aggr lanes, rows [H, 2H) on the root-x lanes;
    remaining rows/cols are zero.  PyTorch Linear stores W as (out, in); w_l /
    w_r here are already the (in, out) transpose so the kernel contracts
    feats @ W directly.  Call-invariant for fixed params: pack once.
    """
    h_in, h_out = w_l.shape
    w = jnp.zeros((hp, hp), jnp.float32)
    w = w.at[:h_in, :h_out].set(w_l)              # consumes aggr lanes [0, H)
    w = w.at[h_in:2 * h_in, :h_out].set(w_r)      # consumes x    lanes [H, 2H)
    b = jnp.zeros((1, hp), jnp.float32).at[:, :h_out].set(b_l)
    return w.astype(jnp.bfloat16), b


@jax.jit
def gnn_forward(x, adj, dinv, w1, b1, w2, b2):
    """Hot path: pad x, launch the fused 2-layer kernel, slice the result."""
    n, h = x.shape
    np_ = adj.shape[0]
    hp = w1.shape[1]
    assert 2 * h <= hp, "packed K=Hp contraction requires 2*hidden <= 128"
    # TODO(synk): for 2*hidden > 128, fall back to two accumulating K=Hp dots.

    xp = jnp.zeros((np_, hp), jnp.bfloat16).at[:n, :h].set(
        x.astype(jnp.bfloat16))

    out = pl.pallas_call(
        functools.partial(_fused_gnn_kernel, hidden=h),
        out_shape=jax.ShapeDtypeStruct((np_, hp), jnp.float32),
        in_specs=[
            pl.BlockSpec((np_, np_), lambda: (0, 0)),   # adjacency (bf16)
            pl.BlockSpec((np_, 1), lambda: (0, 0)),     # 1/deg (f32)
            pl.BlockSpec((np_, hp), lambda: (0, 0)),    # x (bf16, lane-padded)
            pl.BlockSpec((hp, hp), lambda: (0, 0)),     # layer-1 packed W (bf16)
            pl.BlockSpec((1, hp), lambda: (0, 0)),      # layer-1 bias (f32)
            pl.BlockSpec((hp, hp), lambda: (0, 0)),     # layer-2 packed W (bf16)
            pl.BlockSpec((1, hp), lambda: (0, 0)),      # layer-2 bias (f32)
        ],
        out_specs=pl.BlockSpec((np_, hp), lambda: (0, 0)),
        compiler_params=pltpu.CompilerParams(vmem_limit_bytes=32 * 1024 * 1024),
    )(adj, dinv, xp, w1, b1, w2, b2)
    return out[:n, :h]


def init_params(key, hidden):
    """Deterministic parameter init (shapes match PyG SAGEConv lin_l / lin_r).

    Stored as (in, out) so the kernel can contract feats @ W directly.
    lin_r has no bias in SAGEConv.
    """
    k = jax.random.split(key, 6)
    s = 1.0 / jnp.sqrt(hidden)
    return {
        "w_l1": jax.random.uniform(k[0], (hidden, hidden), jnp.float32, -s, s),
        "w_r1": jax.random.uniform(k[1], (hidden, hidden), jnp.float32, -s, s),
        "b_l1": jax.random.uniform(k[2], (1, hidden), jnp.float32, -s, s),
        "w_l2": jax.random.uniform(k[3], (hidden, hidden), jnp.float32, -s, s),
        "w_r2": jax.random.uniform(k[4], (hidden, hidden), jnp.float32, -s, s),
        "b_l2": jax.random.uniform(k[5], (1, hidden), jnp.float32, -s, s),
    }


if __name__ == "__main__":
    NUM_NODES = 64
    HIDDEN = 32
    NUM_EDGES = 128

    key = jax.random.PRNGKey(0)
    kx, ks, kd, kp = jax.random.split(key, 4)

    x = jax.random.normal(kx, (NUM_NODES, HIDDEN), jnp.float32)
    src = jax.random.randint(ks, (NUM_EDGES,), 0, NUM_NODES, jnp.int32)
    dst = jax.random.randint(kd, (NUM_EDGES,), 0, NUM_NODES, jnp.int32)
    edge_index = jnp.stack([src, dst], axis=0)   # (2, E): row 0 = src, row 1 = dst

    params = init_params(kp, HIDDEN)

    # ---- One-time, call-invariant preprocessing (hoisted out of the hot path).
    NP = padded_size(NUM_NODES)                  # 128: MXU / sublane-dense node axis
    HP = padded_size(HIDDEN)                     # 128: lane-dense feature axis
    adj, dinv = build_count_adjacency(edge_index, NP)
    w1, b1 = pack_layer_params(params["w_l1"], params["w_r1"], params["b_l1"], HP)
    w2, b2 = pack_layer_params(params["w_l2"], params["w_r2"], params["b_l2"], HP)

    # ---- Forward (hot path: pad x + one fused pallas_call).
    out = gnn_forward(x, adj, dinv, w1, b1, w2, b2)
    jax.block_until_ready(out)

    # ---- Pure-JAX reference of the same math (mirrors the kernel's bf16
    # quantization points; the count / 1-deg normalization itself is exact).
    adj_f = adj.astype(jnp.float32)
    xq = jnp.zeros((NP, HP), jnp.float32).at[:NUM_NODES, :HIDDEN].set(
        x.astype(jnp.bfloat16).astype(jnp.float32))

    def ref_layer(src_q, w, b):
        aggr = (adj_f @ src_q) * dinv
        feats = jnp.concatenate(
            [aggr[:, :HIDDEN].astype(jnp.bfloat16).astype(jnp.float32),
             src_q[:, :HP - HIDDEN]], axis=1)
        return feats @ w.astype(jnp.float32) + b

    r1 = jnp.maximum(ref_layer(xq, w1, b1), 0.0)
    r1q = r1.astype(jnp.bfloat16).astype(jnp.float32)
    r2 = ref_layer(r1q, w2, b2)[:NUM_NODES, :HIDDEN]

    err = float(jnp.abs(out - r2).max())
    assert jnp.allclose(out, r2, atol=1e-2, rtol=1e-2), f"max abs err = {err}"

    print("KERNEL_OK")
</pallas_src>

<mosaic_0001>
module attributes {stable_mosaic.version = 11 : i64} {
  func.func @_fused_gnn_kernel(%arg0: memref<128x128xbf16, #tpu.memory_space<vmem>>, %arg1: memref<128x1xf32, #tpu.memory_space<vmem>>, %arg2: memref<128x128xbf16, #tpu.memory_space<vmem>>, %arg3: memref<128x128xbf16, #tpu.memory_space<vmem>>, %arg4: memref<1x128xf32, #tpu.memory_space<vmem>>, %arg5: memref<128x128xbf16, #tpu.memory_space<vmem>>, %arg6: memref<1x128xf32, #tpu.memory_space<vmem>>, %arg7: memref<128x128xf32, #tpu.memory_space<vmem>>) attributes {dimension_semantics = [], scalar_prefetch = 0 : i64, scratch_operands = 0 : i64, tpu.core_type = #tpu.core_type<tc>} {
    %c0 = arith.constant 0 : index
    %c0_0 = arith.constant 0 : index
    %0 = vector.load %arg0[%c0, %c0_0] : memref<128x128xbf16, #tpu.memory_space<vmem>>, vector<128x128xbf16>
    %c0_1 = arith.constant 0 : index
    %c0_2 = arith.constant 0 : index
    %1 = vector.load %arg1[%c0_1, %c0_2] : memref<128x1xf32, #tpu.memory_space<vmem>>, vector<128x1xf32>
    %c0_3 = arith.constant 0 : index
    %c0_4 = arith.constant 0 : index
    %2 = vector.load %arg2[%c0_3, %c0_4] : memref<128x128xbf16, #tpu.memory_space<vmem>>, vector<128x128xbf16>
    %cst = arith.constant dense<0.000000e+00> : vector<128x128xf32>
    %3 = tpu.matmul %0, %2, %cst {dimension_numbers = #tpu.dot_dimension_numbers<[1], [0], [0], [1], [0, 0, 1, 1], [], []>} : vector<128x128xbf16>, vector<128x128xbf16>, vector<128x128xf32> -> vector<128x128xf32>
    %4 = vector.broadcast %1 : vector<128x1xf32> to vector<128x128xf32>
    %5 = arith.mulf %3, %4 : vector<128x128xf32>
    %6 = vector.extract_strided_slice %5 {offsets = [0, 0], sizes = [128, 32], strides = [1, 1]} : vector<128x128xf32> to vector<128x32xf32>
    %7 = arith.truncf %6 : vector<128x32xf32> to vector<128x32xbf16>
    %8 = vector.extract_strided_slice %2 {offsets = [0, 0], sizes = [128, 96], strides = [1, 1]} : vector<128x128xbf16> to vector<128x96xbf16>
    %9 = tpu.concatenate %7, %8 in 1 : vector<128x32xbf16>, vector<128x96xbf16> -> vector<128x128xbf16>
    %c0_5 = arith.constant 0 : index
    %c0_6 = arith.constant 0 : index
    %10 = vector.load %arg3[%c0_5, %c0_6] : memref<128x128xbf16, #tpu.memory_space<vmem>>, vector<128x128xbf16>
    %cst_7 = arith.constant dense<0.000000e+00> : vector<128x128xf32>
    %11 = tpu.matmul %9, %10, %cst_7 {dimension_numbers = #tpu.dot_dimension_numbers<[1], [0], [0], [1], [0, 0, 1, 1], [], []>} : vector<128x128xbf16>, vector<128x128xbf16>, vector<128x128xf32> -> vector<128x128xf32>
    %c0_8 = arith.constant 0 : index
    %c0_9 = arith.constant 0 : index
    %12 = vector.load %arg4[%c0_8, %c0_9] : memref<1x128xf32, #tpu.memory_space<vmem>>, vector<1x128xf32>
    %13 = vector.broadcast %12 : vector<1x128xf32> to vector<128x128xf32>
    %14 = arith.addf %11, %13 : vector<128x128xf32>
    %cst_10 = arith.constant 0.000000e+00 : f32
    %15 = vector.broadcast %cst_10 : f32 to vector<128x128xf32>
    %16 = arith.maximumf %14, %15 : vector<128x128xf32>
    %17 = arith.truncf %16 : vector<128x128xf32> to vector<128x128xbf16>
    %cst_11 = arith.constant dense<0.000000e+00> : vector<128x128xf32>
    %18 = tpu.matmul %0, %17, %cst_11 {dimension_numbers = #tpu.dot_dimension_numbers<[1], [0], [0], [1], [0, 0, 1, 1], [], []>} : vector<128x128xbf16>, vector<128x128xbf16>, vector<128x128xf32> -> vector<128x128xf32>
    %19 = vector.broadcast %1 : vector<128x1xf32> to vector<128x128xf32>
    %20 = arith.mulf %18, %19 : vector<128x128xf32>
    %21 = vector.extract_strided_slice %20 {offsets = [0, 0], sizes = [128, 32], strides = [1, 1]} : vector<128x128xf32> to vector<128x32xf32>
    %22 = arith.truncf %21 : vector<128x32xf32> to vector<128x32xbf16>
    %23 = vector.extract_strided_slice %17 {offsets = [0, 0], sizes = [128, 96], strides = [1, 1]} : vector<128x128xbf16> to vector<128x96xbf16>
    %24 = tpu.concatenate %22, %23 in 1 : vector<128x32xbf16>, vector<128x96xbf16> -> vector<128x128xbf16>
    %c0_12 = arith.constant 0 : index
    %c0_13 = arith.constant 0 : index
    %25 = vector.load %arg5[%c0_12, %c0_13] : memref<128x128xbf16, #tpu.memory_space<vmem>>, vector<128x128xbf16>
    %cst_14 = arith.constant dense<0.000000e+00> : vector<128x128xf32>
    %26 = tpu.matmul %24, %25, %cst_14 {dimension_numbers = #tpu.dot_dimension_numbers<[1], [0], [0], [1], [0, 0, 1, 1], [], []>} : vector<128x128xbf16>, vector<128x128xbf16>, vector<128x128xf32> -> vector<128x128xf32>
    %c0_15 = arith.constant 0 : index
    %c0_16 = arith.constant 0 : index
    %27 = vector.load %arg6[%c0_15, %c0_16] : memref<1x128xf32, #tpu.memory_space<vmem>>, vector<1x128xf32>
    %28 = vector.broadcast %27 : vector<1x128xf32> to vector<128x128xf32>
    %29 = arith.addf %26, %28 : vector<128x128xf32>
    %c0_17 = arith.constant 0 : index
    %c0_18 = arith.constant 0 : index
    %30 = vector.load %arg7[%c0_17, %c0_18] : memref<128x128xf32, #tpu.memory_space<vmem>>, vector<128x128xf32>
    tpu.vector_store %arg7[%c0_17, %c0_18], %29 {strides = array<i32>} : memref<128x128xf32, #tpu.memory_space<vmem>>, vector<128x128xf32>,
    return
  }
}

</mosaic_0001>

<bundles_post_ra>
// kernel: gnn_forward.1
= control target key start
LH: loop header
LB: loop body
LE: loop exit
PB: predicated region body
PF: predicated region fallthrough
CT: control target
= control target key end

     0   :  { %v1090_v0 = vmov 0   ;;  %s1091_s9 = smov 32   ;;  %vm387_vm0 = vcmask 261120   ;;  %s1492_s1 = inlined_call_operand.vmem [shape: f32[128,1], index: 1, kind: input, shape index: {}]   ;;  %s1493_s2 = inlined_call_operand.vmem [shape: bf16[128,128], index: 2, kind: input, shape index: {}]   ;;  %s1494_s0 = inlined_call_operand.vmem [shape: bf16[128,128], index: 0, kind: input, shape index: {}]   ;;  %s1495_s3 = inlined_call_operand.vmem [shape: bf16[128,128], index: 3, kind: input, shape index: {}]   ;;  %s1496_s4 = inlined_call_operand.vmem [shape: f32[1,128], index: 4, kind: input, shape index: {}]   ;;  %s1497_s5 = inlined_call_operand.vmem [shape: bf16[128,128], index: 5, kind: input, shape index: {}]   ;;  %s1498_s6 = inlined_call_operand.vmem [shape: f32[1,128], index: 6, kind: input, shape index: {}]   ;;  %s1499_s7 = inlined_call_operand.vmem [shape: f32[128,128], index: 7, kind: output, shape index: {}]  }
   0x1   :  { %1085 = vset.pattern.permute.xlu0 %v1090_v0  ;;  %v42_v1 = vld [vmem:[%s1492_s1] sm:$0xff]  ;;  %v1138_v2 = vld [vmem:[%s1493_s2 + $0x38] sm:$0xff]  ;;  %1086 = vset.pattern.permute.xlu1 %v1090_v0  ;;  %v1065_v4 = vld [vmem:[%s1493_s2 + $0x30] sm:$0xff] }
   0x2   :  { %221 = vperm.xlu0 %1085, %v42_v1   ;;  %v1059_v3 = vld [vmem:[%s1493_s2] sm:$0xff]  ;;  %1087 = vset.pattern.permute.xlu2 %v1090_v0  ;;  %v43_v5 = vld [vmem:[%s1492_s1 + $0x8] sm:$0xff]  ;;  %v44_v7 = vld [vmem:[%s1492_s1 + $0x10] sm:$0xff] }
   0x3   :  { %170 = vmatpush.bf16.msra.mxu0 %v1138_v2  ;;  %371 = vrot.lane.b32.xlu1 %v1059_v3, %s1091_s9  ;;  %v1064_v6 = vld [vmem:[%s1493_s2 + $0x28] sm:$0xff]  ;;  %v1063_v8 = vld [vmem:[%s1493_s2 + $0x20] sm:$0xff]  ;;  %v1062_v10 = vld [vmem:[%s1493_s2 + $0x18] sm:$0xff] }
   0x4   :  { %v46_v9 = vld [vmem:[%s1492_s1 + $0x20] sm:$0xff]  ;;  %v47_v11 = vld [vmem:[%s1492_s1 + $0x28] sm:$0xff]  ;;  %v1061_v12 = vld [vmem:[%s1493_s2 + $0x10] sm:$0xff] }
   0x5   :  { %v48_v13 = vld [vmem:[%s1492_s1 + $0x30] sm:$0xff]  ;;  %v1060_v14 = vld [vmem:[%s1493_s2 + $0x8] sm:$0xff]  ;;  %v49_v15 = vld [vmem:[%s1492_s1 + $0x38] sm:$0xff] }
   0x6   :  { %v1184_v16 = vld [vmem:[%s1494_s0] sm:$0xff]  ;;  %v51_v18 = vld [vmem:[%s1492_s1 + $0x48] sm:$0xff]  ;;  %v52_v19 = vld [vmem:[%s1492_s1 + $0x50] sm:$0xff] }
   0x7   :  { %171 = vmatpush.bf16.msra.mxu0 %v1065_v4  ;;  %v50_v17 = vld [vmem:[%s1492_s1 + $0x40] sm:$0xff]  ;;  %v53_v20 = vld [vmem:[%s1492_s1 + $0x58] sm:$0xff]  ;;  %v1202_v21 = vld [vmem:[%s1494_s0 + $0x8] sm:$0xff] }
   0x8   :  { %v54_v22 = vld [vmem:[%s1492_s1 + $0x60] sm:$0xff]  ;;  %v55_v23 = vld [vmem:[%s1492_s1 + $0x68] sm:$0xff]  ;;  %v45_v24 = vld [vmem:[%s1492_s1 + $0x18] sm:$0xff] }
   0x9   :  { %236 = vperm.xlu2 %1087, %v45_v24   ;;  %v56_v25 = vld [vmem:[%s1492_s1 + $0x70] sm:$0xff]  ;;  %v57_v26 = vld [vmem:[%s1492_s1 + $0x78] sm:$0xff]  ;;  %v1240_v29 = vld [vmem:[%s1494_s0 + $0x20] sm:$0xff] }
   0xa   :  { %226 = vperm.xlu0 %1085, %v43_v5   ;;  %v1224_v27 = vld [vmem:[%s1494_s0 + $0x10] sm:$0xff]  ;;  %v1232_v28 = vld [vmem:[%s1494_s0 + $0x18] sm:$0xff]  ;;  %v1249_v30 = vld [vmem:[%s1494_s0 + $0x28] sm:$0xff] }
   0xb   :  { %172 = vmatpush.bf16.msra.mxu0 %v1064_v6  ;;  %231 = vperm.xlu1 %1086, %v44_v7   ;;  %v1074_v31 = vld [vmem:[%s1495_s3 + $0x38] sm:$0xff]  ;;  %v1073_v32 = vld [vmem:[%s1495_s3 + $0x30] sm:$0xff]  ;;  %v1072_v33 = vld [vmem:[%s1495_s3 + $0x28] sm:$0xff] }
   0xc   :  { %488 = vmatpush.bf16.msra.mxu1 %v1074_v31  ;;  %v1071_v34 = vld [vmem:[%s1495_s3 + $0x20] sm:$0xff]  ;;  %v1267_v35 = vld [vmem:[%s1494_s0 + $0x30] sm:$0xff]  ;;  %v1070_v36 = vld [vmem:[%s1495_s3 + $0x18] sm:$0xff] }
   0xd   :  { %v1069_v37 = vld [vmem:[%s1495_s3 + $0x10] sm:$0xff]  ;;  %v1068_v38 = vld [vmem:[%s1495_s3 + $0x8] sm:$0xff]  ;;  %v1067_v39 = vld [vmem:[%s1495_s3] sm:$0xff] }
   0xe   :  { %v1285_v40 = vld [vmem:[%s1494_s0 + $0x38] sm:$0xff] }
   0xf   :  { %173 = vmatpush.bf16.msra.mxu0 %v1063_v8 }
  0x10   :  { %489 = vmatpush.bf16.msra.mxu1 %v1073_v32 }
  0x11   :  { %373 = vrot.lane.b32.xlu2 %v1060_v14, %s1091_s9 }
  0x12   :  { %241 = vperm.xlu0 %1085, %v46_v9  }
  0x13   :  { %174 = vmatpush.bf16.msra.mxu0 %v1062_v10  ;;  %246 = vperm.xlu1 %1086, %v47_v11  }
  0x14   :  { %490 = vmatpush.bf16.msra.mxu1 %v1072_v33 }
  0x17   :  { %175 = vmatpush.bf16.msra.mxu0 %v1061_v12 }
  0x18   :  { %491 = vmatpush.bf16.msra.mxu1 %v1071_v34 }
  0x19   :  { %375 = vrot.lane.b32.xlu2 %v1061_v12, %s1091_s9 }
  0x1a   :  { %251 = vperm.xlu0 %1085, %v48_v13  }
  0x1b   :  { %176 = vmatpush.bf16.msra.mxu0 %v1060_v14  ;;  %256 = vperm.xlu1 %1086, %v49_v15  }
  0x1c   :  { %492 = vmatpush.bf16.msra.mxu1 %v1070_v36 }
  0x1f   :  { %177 = vmatpush.bf16.msra.mxu0 %v1059_v3 }
  0x20   :  { %493 = vmatpush.bf16.msra.mxu1 %v1069_v37 }
  0x21   :  { %377 = vrot.lane.b32.xlu2 %v1062_v10, %s1091_s9 }
  0x22   :  { %261 = vperm.xlu0 %1085, %v50_v17   ;;  %178 = vmatmul.bf16.vlgmr.msra.gmra.mxu0 %v1184_v16 }
  0x23   :  { %266 = vperm.xlu1 %1086, %v51_v18  }
  0x24   :  { %494 = vmatpush.bf16.msra.mxu1 %v1068_v38 }
  0x28   :  { %495 = vmatpush.bf16.msra.mxu1 %v1067_v39 }
  0x29   :  { %379 = vrot.lane.b32.xlu2 %v1063_v8, %s1091_s9 }
  0x2a   :  { %271 = vperm.xlu0 %1085, %v52_v19  }
  0x2b   :  { %276 = vperm.xlu1 %1086, %v53_v20  }
  0x31   :  { %381 = vrot.lane.b32.xlu2 %v1064_v6, %s1091_s9 }
  0x32   :  { %281 = vperm.xlu0 %1085, %v54_v22   ;;  %183 = vmatmul.bf16.gmra.mxu0 %v1202_v21 }
  0x33   :  { %286 = vperm.xlu1 %1086, %v55_v23  }
  0x39   :  { %383 = vrot.lane.b32.xlu2 %v1065_v4, %s1091_s9 }
  0x3a   :  { %291 = vperm.xlu0 %1085, %v56_v25  }
  0x3b   :  { %296 = vperm.xlu1 %1086, %v57_v26  }
  0x41   :  { %385 = vrot.lane.b32.xlu2 %v1138_v2, %s1091_s9 }
  0x42   :  { %188 = vmatmul.bf16.gmra.mxu0 %v1224_v27 }
  0x52   :  { %193 = vmatmul.bf16.gmra.mxu0 %v1232_v28 }
  0x62   :  { %198 = vmatmul.bf16.gmra.mxu0 %v1240_v29 }
  0x63   :  { %v1297_v56 = vpop.permute.xlu2 %236 }
  0x6b   :  { %v374_v0 = vpop.permute.xlu2 %373 }
  0x72   :  { %203 = vmatmul.bf16.gmra.mxu0 %v1249_v30 }
  0x73   :  { %v376_v13 = vpop.permute.xlu2 %375 }
  0x74   :  { %v1288_v41 = vpop.permute.xlu0 %221 }
  0x75   :  { %v372_v48 = vpop.permute.xlu1 %371 }
  0x7b   :  { %v378_v32 = vpop.permute.xlu2 %377 }
  0x7c   :  { %v1291_v44 = vpop.permute.xlu0 %226 }
  0x7d   :  { %v1295_v55 = vpop.permute.xlu1 %231 }
  0x82   :  { %208 = vmatmul.bf16.gmra.mxu0 %v1267_v35 }
  0x84   :  { %v1302_v4 = vpop.permute.xlu0 %241 }
  0x85   :  { %v1305_v6 = vpop.permute.xlu1 %246 }
  0x8c   :  { %v1309_v18 = vpop.permute.xlu0 %251 }
  0x8d   :  { %v1312_v20 = vpop.permute.xlu1 %256 }
  0x92   :  { %213 = vmatmul.bf16.gmra.mxu0 %v1285_v40 }
  0x94   :  { %v1316_v37 = vpop.permute.xlu0 %261 }
  0x95   :  { %v1319_v39 = vpop.permute.xlu1 %266 }
  0x9f   :  { %v179_v42 = vpop.f32.mrf.mxu0 }
  0xa0   :  { %v299_v43 = vmul.f32 %v1288_v41, %v179_v42 }
  0xa2   :  { %v315_v46 = vpack.c.bf16 %v299_v43, %v299_v43 }
  0xa4   :  { %v347_v50 = vunpack.c.l.b16 %v315_v46 }
  0xa7   :  { %v181_v45 = vpop.f32.mrf.mxu0 }
  0xa8   :  { %v300_v47 = vmul.f32 %v1291_v44, %v181_v45 }
  0xaa   :  { %v316_v49 = vpack.c.bf16 %v300_v47, %v300_v47 }
  0xac   :  { %v348_v51 = vunpack.c.l.b16 %v316_v49  ;;  %v380_v49 = vpop.permute.xlu2 %379 }
  0xae   :  { %v363_v52 = vpack.c.b16 %v348_v51, %v347_v50 }
  0xaf   :  { %v184_v53 = vpop.f32.mrf.mxu0 }
  0xb0   :  { %v390_v54 = vsel %vm387_vm0, %v363_v52, %v372_v48  ;;  %v301_v57 = vmul.f32 %v1295_v55, %v184_v53  ;;  %v1323_v53 = vpop.permute.xlu0 %271 }
  0xb1   :  { %496 = vmatmul.bf16.vlgmr.msra.gmra.mxu1 %v390_v54 }
  0xb2   :  { %v317_v59 = vpack.c.bf16 %v301_v57, %v301_v57  ;;  %v1326_v57 = vpop.permute.xlu1 %276 }
  0xb4   :  { %v349_v62 = vunpack.c.l.b16 %v317_v59 }
  0xb7   :  { %v186_v58 = vpop.f32.mrf.mxu0 }
  0xb8   :  { %v302_v60 = vmul.f32 %v1297_v56, %v186_v58 }
  0xba   :  { %v318_v61 = vpack.c.bf16 %v302_v60, %v302_v60 }
  0xbc   :  { %v350_v63 = vunpack.c.l.b16 %v318_v61 }
  0xbe   :  { %v364_v1 = vpack.c.b16 %v350_v63, %v349_v62 }
  0xbf   :  { %v189_v2 = vpop.f32.mrf.mxu0 }
  0xc0   :  { %v394_v3 = vsel %vm387_vm0, %v364_v1, %v374_v0  ;;  %v303_v5 = vmul.f32 %v1302_v4, %v189_v2  ;;  %v382_v0 = vpop.permute.xlu2 %381 }
  0xc1   :  { %501 = vmatmul.bf16.gmra.mxu1 %v394_v3 }
  0xc2   :  { %v319_v8 = vpack.c.bf16 %v303_v5, %v303_v5  ;;  %v1330_v5 = vpop.permute.xlu0 %281 }
  0xc4   :  { %v351_v11 = vunpack.c.l.b16 %v319_v8  ;;  %v1333_v8 = vpop.permute.xlu1 %286 }
  0xc7   :  { %v191_v7 = vpop.f32.mrf.mxu0 }
  0xc8   :  { %v304_v9 = vmul.f32 %v1305_v6, %v191_v7 }
  0xca   :  { %v320_v10 = vpack.c.bf16 %v304_v9, %v304_v9 }
  0xcc   :  { %v352_v12 = vunpack.c.l.b16 %v320_v10 }
  0xce   :  { %v365_v14 = vpack.c.b16 %v352_v12, %v351_v11 }
  0xcf   :  { %v194_v15 = vpop.f32.mrf.mxu0 }
  0xd0   :  { %v398_v17 = vsel %vm387_vm0, %v365_v14, %v376_v13  ;;  %v305_v19 = vmul.f32 %v1309_v18, %v194_v15  ;;  %v384_v15 = vpop.permute.xlu2 %383 }
  0xd1   :  { %506 = vmatmul.bf16.gmra.mxu1 %v398_v17 }
  0xd2   :  { %v321_v23 = vpack.c.bf16 %v305_v19, %v305_v19 }
  0xd4   :  { %v353_v26 = vunpack.c.l.b16 %v321_v23  ;;  %v1337_v23 = vpop.permute.xlu0 %291 }
  0xd7   :  { %v196_v22 = vpop.f32.mrf.mxu0 }
  0xd8   :  { %v306_v24 = vmul.f32 %v1312_v20, %v196_v22 }
  0xda   :  { %v322_v25 = vpack.c.bf16 %v306_v24, %v306_v24 }
  0xdc   :  { %v354_v31 = vunpack.c.l.b16 %v322_v25  ;;  %v1340_v25 = vpop.permute.xlu1 %296 }
  0xde   :  { %v366_v33 = vpack.c.b16 %v354_v31, %v353_v26 }
  0xdf   :  { %v199_v34 = vpop.f32.mrf.mxu0 }
  0xe0   :  { %v402_v36 = vsel %vm387_vm0, %v366_v33, %v378_v32  ;;  %v307_v38 = vmul.f32 %v1316_v37, %v199_v34 }
  0xe1   :  { %511 = vmatmul.bf16.gmra.mxu1 %v402_v36 }
  0xe2   :  { %v323_v43 = vpack.c.bf16 %v307_v38, %v307_v38  ;;  %v386_v38 = vpop.permute.xlu2 %385 }
  0xe4   :  { %v355_v47 = vunpack.c.l.b16 %v323_v43 }
  0xe7   :  { %v201_v42 = vpop.f32.mrf.mxu0 }
  0xe8   :  { %v308_v45 = vmul.f32 %v1319_v39, %v201_v42 }
  0xea   :  { %v324_v46 = vpack.c.bf16 %v308_v45, %v308_v45  ;;  %v1347_v45 = vld [vmem:[%s1496_s4] ss:$0 sm:$0xff] }
  0xec   :  { %v356_v48 = vunpack.c.l.b16 %v324_v46 }
  0xee   :  { %v367_v50 = vpack.c.b16 %v356_v48, %v355_v47 }
  0xef   :  { %v204_v51 = vpop.f32.mrf.mxu0 }
  0xf0   :  { %v406_v52 = vsel %vm387_vm0, %v367_v50, %v380_v49  ;;  %v309_v54 = vmul.f32 %v1323_v53, %v204_v51 }
  0xf1   :  { %516 = vmatmul.bf16.gmra.mxu1 %v406_v52 }
  0xf2   :  { %v325_v59 = vpack.c.bf16 %v309_v54, %v309_v54 }
  0xf4   :  { %v357_v62 = vunpack.c.l.b16 %v325_v59 }
  0xf7   :  { %v206_v58 = vpop.f32.mrf.mxu0 }
  0xf8   :  { %v310_v60 = vmul.f32 %v1326_v57, %v206_v58 }
  0xfa   :  { %v326_v61 = vpack.c.bf16 %v310_v60, %v310_v60 }
  0xfc   :  { %v358_v63 = vunpack.c.l.b16 %v326_v61 }
  0xfe   :  { %v368_v1 = vpack.c.b16 %v358_v63, %v357_v62 }
  0xff   :  { %v209_v2 = vpop.f32.mrf.mxu0 }
 0x100   :  { %v410_v3 = vsel %vm387_vm0, %v368_v1, %v382_v0  ;;  %v311_v7 = vmul.f32 %v1330_v5, %v209_v2 }
 0x101   :  { %521 = vmatmul.bf16.gmra.mxu1 %v410_v3 }
 0x102   :  { %v327_v10 = vpack.c.bf16 %v311_v7, %v311_v7 }
 0x104   :  { %v359_v13 = vunpack.c.l.b16 %v327_v10 }
 0x107   :  { %v211_v9 = vpop.f32.mrf.mxu0 }
 0x108   :  { %v312_v11 = vmul.f32 %v1333_v8, %v211_v9 }
 0x10a   :  { %v328_v12 = vpack.c.bf16 %v312_v11, %v312_v11 }
 0x10c   :  { %v360_v14 = vunpack.c.l.b16 %v328_v12 }
 0x10e   :  { %v369_v17 = vpack.c.b16 %v360_v14, %v359_v13 }
 0x10f   :  { %v214_v19 = vpop.f32.mrf.mxu0 }
 0x110   :  { %v414_v22 = vsel %vm387_vm0, %v369_v17, %v384_v15  ;;  %v313_v24 = vmul.f32 %v1337_v23, %v214_v19 }
 0x111   :  { %526 = vmatmul.bf16.gmra.mxu1 %v414_v22 }
 0x112   :  { %v329_v31 = vpack.c.bf16 %v313_v24, %v313_v24 }
 0x114   :  { %v361_v34 = vunpack.c.l.b16 %v329_v31 }
 0x117   :  { %v216_v26 = vpop.f32.mrf.mxu0 }
 0x118   :  { %v314_v32 = vmul.f32 %v1340_v25, %v216_v26 }
 0x11a   :  { %v330_v33 = vpack.c.bf16 %v314_v32, %v314_v32 }
 0x11c   :  { %v362_v36 = vunpack.c.l.b16 %v330_v33 }
 0x11e   :  { %v370_v42 = vpack.c.b16 %v362_v36, %v361_v34 }
 0x120   :  { %v418_v43 = vsel %vm387_vm0, %v370_v42, %v386_v38 }
 0x121   :  { %531 = vmatmul.bf16.gmra.mxu1 %v418_v43 }
 0x12e   :  { %v497_v46 = vpop.f32.mrf.mxu1 }
 0x12f   :  { %v498_v47 = vadd.f32 %v1347_v45, %v497_v46 }
 0x131   :  { %v537_v48 = vmax.f32 %v498_v47, 0.0 }
 0x133   :  { %v553_v51 = vpack.c.bf16 %v537_v48, %v537_v48 }
 0x135   :  { %v585_v58 = vunpack.c.l.b16 %v553_v51 }
 0x136   :  { %v499_v49 = vpop.f32.mrf.mxu1 }
 0x137   :  { %v500_v50 = vadd.f32 %v1347_v45, %v499_v49 }
 0x139   :  { %v538_v52 = vmax.f32 %v500_v50, 0.0 }
 0x13b   :  { %v554_v54 = vpack.c.bf16 %v538_v52, %v538_v52 }
 0x13d   :  { %v586_v59 = vunpack.c.l.b16 %v554_v54 }
 0x13e   :  { %v502_v60 = vpop.f32.mrf.mxu1 }
 0x13f   :  { %v1351_v61 = vpack.c.b16 %v586_v59, %v585_v58  ;;  %v503_v62 = vadd.f32 %v1347_v45, %v502_v60 }
 0x141   :  { %738 = vrot.lane.b32.xlu0 %v1351_v61, %s1091_s9  ;;  %v539_v63 = vmax.f32 %v503_v62, 0.0 }
 0x143   :  { %v555_v2 = vpack.c.bf16 %v539_v63, %v539_v63 }
 0x145   :  { %v587_v9 = vunpack.c.l.b16 %v555_v2 }
 0x146   :  { %v504_v0 = vpop.f32.mrf.mxu1 }
 0x147   :  { %v505_v1 = vadd.f32 %v1347_v45, %v504_v0 }
 0x149   :  { %v540_v3 = vmax.f32 %v505_v1, 0.0 }
 0x14b   :  { %v556_v7 = vpack.c.bf16 %v540_v3, %v540_v3 }
 0x14d   :  { %v588_v10 = vunpack.c.l.b16 %v556_v7 }
 0x14e   :  { %v507_v11 = vpop.f32.mrf.mxu1 }
 0x14f   :  { %v1357_v12 = vpack.c.b16 %v588_v10, %v587_v9  ;;  %v508_v13 = vadd.f32 %v1347_v45, %v507_v11 }
 0x151   :  { %740 = vrot.lane.b32.xlu1 %v1357_v12, %s1091_s9  ;;  %v541_v14 = vmax.f32 %v508_v13, 0.0 }
 0x153   :  { %v557_v19 = vpack.c.bf16 %v541_v14, %v541_v14 }
 0x155   :  { %v589_v26 = vunpack.c.l.b16 %v557_v19 }
 0x156   :  { %v509_v15 = vpop.f32.mrf.mxu1 }
 0x157   :  { %v510_v17 = vadd.f32 %v1347_v45, %v509_v15 }
 0x159   :  { %v542_v22 = vmax.f32 %v510_v17, 0.0 }
 0x15b   :  { %v558_v24 = vpack.c.bf16 %v542_v22, %v542_v22 }
 0x15d   :  { %v590_v31 = vunpack.c.l.b16 %v558_v24 }
 0x15e   :  { %v512_v32 = vpop.f32.mrf.mxu1 }
 0x15f   :  { %v1363_v33 = vpack.c.b16 %v590_v31, %v589_v26  ;;  %v513_v34 = vadd.f32 %v1347_v45, %v512_v32 }
 0x161   :  { %742 = vrot.lane.b32.xlu2 %v1363_v33, %s1091_s9  ;;  %v543_v36 = vmax.f32 %v513_v34, 0.0 }
 0x163   :  { %v559_v43 = vpack.c.bf16 %v543_v36, %v543_v36 }
 0x165   :  { %v591_v48 = vunpack.c.l.b16 %v559_v43 }
 0x166   :  { %v514_v38 = vpop.f32.mrf.mxu1 }
 0x167   :  { %v515_v42 = vadd.f32 %v1347_v45, %v514_v38 }
 0x169   :  { %v544_v46 = vmax.f32 %v515_v42, 0.0 }
 0x16b   :  { %v560_v47 = vpack.c.bf16 %v544_v46, %v544_v46 }
 0x16d   :  { %v592_v49 = vunpack.c.l.b16 %v560_v47 }
 0x16e   :  { %v517_v50 = vpop.f32.mrf.mxu1 }
 0x16f   :  { %v604_v51 = vpack.c.b16 %v592_v49, %v591_v48  ;;  %v518_v52 = vadd.f32 %v1347_v45, %v517_v50 }
 0x171   :  { %744 = vrot.lane.b32.xlu0 %v604_v51, %s1091_s9  ;;  %v545_v54 = vmax.f32 %v518_v52, 0.0 }
 0x173   :  { %v561_v60 = vpack.c.bf16 %v545_v54, %v545_v54 }
 0x175   :  { %v593_v0 = vunpack.c.l.b16 %v561_v60 }
 0x176   :  { %v519_v58 = vpop.f32.mrf.mxu1 }
 0x177   :  { %v520_v59 = vadd.f32 %v1347_v45, %v519_v58 }
 0x179   :  { %v546_v62 = vmax.f32 %v520_v59, 0.0 }
 0x17b   :  { %v562_v63 = vpack.c.bf16 %v546_v62, %v546_v62 }
 0x17d   :  { %v594_v1 = vunpack.c.l.b16 %v562_v63 }
 0x17e   :  { %v522_v2 = vpop.f32.mrf.mxu1 }
 0x17f   :  { %v605_v3 = vpack.c.b16 %v594_v1, %v593_v0  ;;  %v523_v7 = vadd.f32 %v1347_v45, %v522_v2 }
 0x181   :  { %746 = vrot.lane.b32.xlu1 %v605_v3, %s1091_s9  ;;  %v547_v9 = vmax.f32 %v523_v7, 0.0 }
 0x183   :  { %v563_v13 = vpack.c.bf16 %v547_v9, %v547_v9 }
 0x185   :  { %v595_v17 = vunpack.c.l.b16 %v563_v13 }
 0x186   :  { %v524_v10 = vpop.f32.mrf.mxu1 }
 0x187   :  { %v525_v11 = vadd.f32 %v1347_v45, %v524_v10 }
 0x189   :  { %v548_v14 = vmax.f32 %v525_v11, 0.0 }
 0x18b   :  { %v564_v15 = vpack.c.bf16 %v548_v14, %v548_v14 }
 0x18d   :  { %v596_v19 = vunpack.c.l.b16 %v564_v15 }
 0x18e   :  { %v527_v22 = vpop.f32.mrf.mxu1 }
 0x18f   :  { %v606_v24 = vpack.c.b16 %v596_v19, %v595_v17  ;;  %v528_v26 = vadd.f32 %v1347_v45, %v527_v22 }
 0x191   :  { %748 = vrot.lane.b32.xlu2 %v606_v24, %s1091_s9  ;;  %v549_v31 = vmax.f32 %v528_v26, 0.0 }
 0x193   :  { %v565_v36 = vpack.c.bf16 %v549_v31, %v549_v31 }
 0x195   :  { %v597_v43 = vunpack.c.l.b16 %v565_v36 }
 0x196   :  { %v529_v32 = vpop.f32.mrf.mxu1 }
 0x197   :  { %v530_v34 = vadd.f32 %v1347_v45, %v529_v32 }
 0x199   :  { %v550_v38 = vmax.f32 %v530_v34, 0.0 }
 0x19b   :  { %v566_v42 = vpack.c.bf16 %v550_v38, %v550_v38 }
 0x19d   :  { %v598_v46 = vunpack.c.l.b16 %v566_v42 }
 0x19e   :  { %v532_v47 = vpop.f32.mrf.mxu1 }
 0x19f   :  { %v607_v48 = vpack.c.b16 %v598_v46, %v597_v43  ;;  %v533_v49 = vadd.f32 %v1347_v45, %v532_v47 }
 0x1a1   :  { %750 = vrot.lane.b32.xlu0 %v607_v48, %s1091_s9  ;;  %v551_v50 = vmax.f32 %v533_v49, 0.0 }
 0x1a3   :  { %v567_v58 = vpack.c.bf16 %v551_v50, %v551_v50 }
 0x1a5   :  { %v599_v62 = vunpack.c.l.b16 %v567_v58 }
 0x1a6   :  { %v534_v52 = vpop.f32.mrf.mxu1 }
 0x1a7   :  { %v535_v54 = vadd.f32 %v1347_v45, %v534_v52  ;;  %v1082_v45 = vld [vmem:[%s1497_s5 + $0x38] sm:$0xff] }
 0x1a8   :  { %854 = vmatpush.bf16.msra.mxu3 %v1082_v45 }
 0x1a9   :  { %v552_v59 = vmax.f32 %v535_v54, 0.0 }
 0x1ab   :  { %v568_v60 = vpack.c.bf16 %v552_v59, %v552_v59 }
 0x1ad   :  { %v600_v63 = vunpack.c.l.b16 %v568_v60 }
 0x1af   :  { %v608_v0 = vpack.c.b16 %v600_v63, %v599_v62 }
 0x1b1   :  { %752 = vrot.lane.b32.xlu1 %v608_v0, %s1091_s9  ;;  %617 = vmatpush.bf16.msra.mxu2 %v608_v0 }
 0x1b3   :  { %v739_v10 = vpop.permute.xlu0 %738 }
 0x1b5   :  { %618 = vmatpush.bf16.msra.mxu2 %v607_v48 }
 0x1b9   :  { %619 = vmatpush.bf16.msra.mxu2 %v606_v24 }
 0x1bd   :  { %620 = vmatpush.bf16.msra.mxu2 %v605_v3 }
 0x1c1   :  { %621 = vmatpush.bf16.msra.mxu2 %v604_v51 }
 0x1c5   :  { %622 = vmatpush.bf16.msra.mxu2 %v1363_v33 }
 0x1c9   :  { %623 = vmatpush.bf16.msra.mxu2 %v1357_v12 }
 0x1cd   :  { %624 = vmatpush.bf16.msra.mxu2 %v1351_v61  ;;  %v1081_v61 = vld [vmem:[%s1497_s5 + $0x30] sm:$0xff] }
 0x1ce   :  { %855 = vmatpush.bf16.msra.mxu3 %v1081_v61 }
 0x1d0   :  { %625 = vmatmul.bf16.vlgmr.msra.gmra.mxu2 %v1184_v16  ;;  %v1080_v16 = vld [vmem:[%s1497_s5 + $0x28] sm:$0xff] }
 0x1d2   :  { %856 = vmatpush.bf16.msra.mxu3 %v1080_v16 }
 0x1e0   :  { %630 = vmatmul.bf16.gmra.mxu2 %v1202_v21  ;;  %v1079_v21 = vld [vmem:[%s1497_s5 + $0x20] sm:$0xff] }
 0x1e1   :  { %857 = vmatpush.bf16.msra.mxu3 %v1079_v21 }
 0x1f0   :  { %635 = vmatmul.bf16.gmra.mxu2 %v1224_v27  ;;  %v1078_v27 = vld [vmem:[%s1497_s5 + $0x18] sm:$0xff] }
 0x1f1   :  { %858 = vmatpush.bf16.msra.mxu3 %v1078_v27 }
 0x200   :  { %640 = vmatmul.bf16.gmra.mxu2 %v1232_v28  ;;  %v1077_v28 = vld [vmem:[%s1497_s5 + $0x10] sm:$0xff] }
 0x201   :  { %859 = vmatpush.bf16.msra.mxu3 %v1077_v28 }
 0x210   :  { %645 = vmatmul.bf16.gmra.mxu2 %v1240_v29  ;;  %v1076_v29 = vld [vmem:[%s1497_s5 + $0x8] sm:$0xff] }
 0x211   :  { %860 = vmatpush.bf16.msra.mxu3 %v1076_v29 }
 0x220   :  { %650 = vmatmul.bf16.gmra.mxu2 %v1249_v30  ;;  %v1075_v30 = vld [vmem:[%s1497_s5] sm:$0xff] }
 0x221   :  { %861 = vmatpush.bf16.msra.mxu3 %v1075_v30 }
 0x230   :  { %655 = vmatmul.bf16.gmra.mxu2 %v1267_v35 }
 0x240   :  { %660 = vmatmul.bf16.gmra.mxu2 %v1285_v40 }
 0x253   :  { %v626_v35 = vpop.f32.mrf.mxu2 }
 0x254   :  { %v666_v12 = vmul.f32 %v626_v35, %v1288_v41 }
 0x256   :  { %v682_v51 = vpack.c.bf16 %v666_v12, %v666_v12 }
 0x258   :  { %v714_v3 = vunpack.c.l.b16 %v682_v51 }
 0x25b   :  { %v628_v33 = vpop.f32.mrf.mxu2 }
 0x25c   :  { %v667_v1 = vmul.f32 %v628_v33, %v1291_v44  ;;  %v741_v44 = vpop.permute.xlu1 %740 }
 0x25e   :  { %v683_v2 = vpack.c.bf16 %v667_v1, %v667_v1 }
 0x260   :  { %v715_v7 = vunpack.c.l.b16 %v683_v2 }
 0x262   :  { %v730_v9 = vpack.c.b16 %v715_v7, %v714_v3 }
 0x263   :  { %v631_v11 = vpop.f32.mrf.mxu2 }
 0x264   :  { %v756_v40 = vsel %vm387_vm0, %v730_v9, %v739_v10  ;;  %v668_v13 = vmul.f32 %v631_v11, %v1295_v55 }
 0x265   :  { %862 = vmatmul.bf16.vlgmr.msra.gmra.mxu3 %v756_v40 }
 0x266   :  { %v684_v15 = vpack.c.bf16 %v668_v13, %v668_v13 }
 0x268   :  { %v716_v19 = vunpack.c.l.b16 %v684_v15 }
 0x26b   :  { %v633_v14 = vpop.f32.mrf.mxu2 }
 0x26c   :  { %v669_v17 = vmul.f32 %v633_v14, %v1297_v56  ;;  %v743_v56 = vpop.permute.xlu2 %742 }
 0x26e   :  { %v685_v41 = vpack.c.bf16 %v669_v17, %v669_v17 }
 0x270   :  { %v717_v22 = vunpack.c.l.b16 %v685_v41 }
 0x272   :  { %v731_v24 = vpack.c.b16 %v717_v22, %v716_v19 }
 0x273   :  { %v636_v26 = vpop.f32.mrf.mxu2 }
 0x274   :  { %v760_v31 = vsel %vm387_vm0, %v731_v24, %v741_v44  ;;  %v670_v32 = vmul.f32 %v636_v26, %v1302_v4 }
 0x275   :  { %867 = vmatmul.bf16.gmra.mxu3 %v760_v31 }
 0x276   :  { %v686_v36 = vpack.c.bf16 %v670_v32, %v670_v32 }
 0x278   :  { %v718_v42 = vunpack.c.l.b16 %v686_v36 }
 0x27b   :  { %v638_v34 = vpop.f32.mrf.mxu2 }
 0x27c   :  { %v671_v38 = vmul.f32 %v638_v34, %v1305_v6  ;;  %v745_v6 = vpop.permute.xlu0 %744 }
 0x27e   :  { %v687_v55 = vpack.c.bf16 %v671_v38, %v671_v38  ;;  %v1089_v38 = vld [vmem:[%s1498_s6] ss:$0 sm:$0xff] }
 0x280   :  { %v719_v43 = vunpack.c.l.b16 %v687_v55 }
 0x282   :  { %v732_v46 = vpack.c.b16 %v719_v43, %v718_v42 }
 0x283   :  { %v641_v47 = vpop.f32.mrf.mxu2 }
 0x284   :  { %v764_v48 = vsel %vm387_vm0, %v732_v46, %v743_v56  ;;  %v672_v49 = vmul.f32 %v641_v47, %v1309_v18 }
 0x285   :  { %872 = vmatmul.bf16.gmra.mxu3 %v764_v48 }
 0x286   :  { %v688_v52 = vpack.c.bf16 %v672_v49, %v672_v49 }
 0x288   :  { %v720_v58 = vunpack.c.l.b16 %v688_v52 }
 0x28b   :  { %v643_v50 = vpop.f32.mrf.mxu2 }
 0x28c   :  { %v673_v54 = vmul.f32 %v643_v50, %v1312_v20  ;;  %v747_v20 = vpop.permute.xlu1 %746 }
 0x28e   :  { %v689_v4 = vpack.c.bf16 %v673_v54, %v673_v54 }
 0x290   :  { %v721_v59 = vunpack.c.l.b16 %v689_v4 }
 0x292   :  { %v733_v60 = vpack.c.b16 %v721_v59, %v720_v58 }
 0x293   :  { %v646_v62 = vpop.f32.mrf.mxu2 }
 0x294   :  { %v768_v63 = vsel %vm387_vm0, %v733_v60, %v745_v6  ;;  %v674_v0 = vmul.f32 %v646_v62, %v1316_v37 }
 0x295   :  { %877 = vmatmul.bf16.gmra.mxu3 %v768_v63 }
 0x296   :  { %v690_v61 = vpack.c.bf16 %v674_v0, %v674_v0 }
 0x298   :  { %v722_v21 = vunpack.c.l.b16 %v690_v61 }
 0x29b   :  { %v648_v45 = vpop.f32.mrf.mxu2 }
 0x29c   :  { %v675_v16 = vmul.f32 %v648_v45, %v1319_v39  ;;  %v749_v39 = vpop.permute.xlu2 %748 }
 0x29e   :  { %v691_v18 = vpack.c.bf16 %v675_v16, %v675_v16 }
 0x2a0   :  { %v723_v27 = vunpack.c.l.b16 %v691_v18 }
 0x2a2   :  { %v734_v28 = vpack.c.b16 %v723_v27, %v722_v21 }
 0x2a3   :  { %v651_v29 = vpop.f32.mrf.mxu2 }
 0x2a4   :  { %v772_v30 = vsel %vm387_vm0, %v734_v28, %v747_v20  ;;  %v676_v35 = vmul.f32 %v651_v29, %v1323_v53 }
 0x2a5   :  { %882 = vmatmul.bf16.gmra.mxu3 %v772_v30 }
 0x2a6   :  { %v692_v33 = vpack.c.bf16 %v676_v35, %v676_v35 }
 0x2a8   :  { %v724_v1 = vunpack.c.l.b16 %v692_v33 }
 0x2ab   :  { %v653_v12 = vpop.f32.mrf.mxu2 }
 0x2ac   :  { %v677_v51 = vmul.f32 %v653_v12, %v1326_v57  ;;  %v751_v57 = vpop.permute.xlu0 %750 }
 0x2ae   :  { %v693_v37 = vpack.c.bf16 %v677_v51, %v677_v51 }
 0x2b0   :  { %v725_v2 = vunpack.c.l.b16 %v693_v37 }
 0x2b2   :  { %v735_v3 = vpack.c.b16 %v725_v2, %v724_v1 }
 0x2b3   :  { %v656_v7 = vpop.f32.mrf.mxu2 }
 0x2b4   :  { %v776_v9 = vsel %vm387_vm0, %v735_v3, %v749_v39  ;;  %v678_v10 = vmul.f32 %v656_v7, %v1330_v5 }
 0x2b5   :  { %887 = vmatmul.bf16.gmra.mxu3 %v776_v9 }
 0x2b6   :  { %v694_v40 = vpack.c.bf16 %v678_v10, %v678_v10 }
 0x2b8   :  { %v726_v14 = vunpack.c.l.b16 %v694_v40 }
 0x2bb   :  { %v658_v11 = vpop.f32.mrf.mxu2 }
 0x2bc   :  { %v679_v13 = vmul.f32 %v658_v11, %v1333_v8  ;;  %v753_v8 = vpop.permute.xlu1 %752 }
 0x2be   :  { %v695_v53 = vpack.c.bf16 %v679_v13, %v679_v13 }
 0x2c0   :  { %v727_v15 = vunpack.c.l.b16 %v695_v53 }
 0x2c2   :  { %v736_v17 = vpack.c.b16 %v727_v15, %v726_v14 }
 0x2c3   :  { %v661_v41 = vpop.f32.mrf.mxu2 }
 0x2c4   :  { %v780_v19 = vsel %vm387_vm0, %v736_v17, %v751_v57  ;;  %v680_v22 = vmul.f32 %v661_v41, %v1337_v23 }
 0x2c5   :  { %892 = vmatmul.bf16.gmra.mxu3 %v780_v19 }
 0x2c6   :  { %v696_v44 = vpack.c.bf16 %v680_v22, %v680_v22 }
 0x2c8   :  { %v728_v31 = vunpack.c.l.b16 %v696_v44 }
 0x2cb   :  { %v663_v24 = vpop.f32.mrf.mxu2 }
 0x2cc   :  { %v681_v26 = vmul.f32 %v663_v24, %v1340_v25 }
 0x2ce   :  { %v697_v5 = vpack.c.bf16 %v681_v26, %v681_v26 }
 0x2d0   :  { %v729_v32 = vunpack.c.l.b16 %v697_v5 }
 0x2d2   :  { %v737_v34 = vpack.c.b16 %v729_v32, %v728_v31 }
 0x2d4   :  { %v784_v36 = vsel %vm387_vm0, %v737_v34, %v753_v8 }
 0x2d5   :  { %897 = vmatmul.bf16.gmra.mxu3 %v784_v36 }
 0x2e8   :  { %v863_v55 = vpop.f32.mrf.mxu3 }
 0x2e9   :  { %v864_v42 = vadd.f32 %v1089_v38, %v863_v55 }
 0x2eb   :  { %903 = vst [vmem:[%s1499_s7] sm:$0xff] %v864_v42 }
 0x2f0   :  { %v865_v23 = vpop.f32.mrf.mxu3 }
 0x2f1   :  { %v866_v25 = vadd.f32 %v1089_v38, %v865_v23 }
 0x2f3   :  { %904 = vst [vmem:[%s1499_s7 + $0x8] sm:$0xff] %v866_v25 }
 0x2f8   :  { %v868_v43 = vpop.f32.mrf.mxu3 }
 0x2f9   :  { %v869_v46 = vadd.f32 %v1089_v38, %v868_v43 }
 0x2fb   :  { %905 = vst [vmem:[%s1499_s7 + $0x10] sm:$0xff] %v869_v46 }
 0x300   :  { %v870_v56 = vpop.f32.mrf.mxu3 }
 0x301   :  { %v871_v47 = vadd.f32 %v1089_v38, %v870_v56 }
 0x303   :  { %906 = vst [vmem:[%s1499_s7 + $0x18] sm:$0xff] %v871_v47 }
 0x308   :  { %v873_v48 = vpop.f32.mrf.mxu3 }
 0x309   :  { %v874_v49 = vadd.f32 %v1089_v38, %v873_v48 }
 0x30b   :  { %907 = vst [vmem:[%s1499_s7 + $0x20] sm:$0xff] %v874_v49 }
 0x310   :  { %v875_v50 = vpop.f32.mrf.mxu3 }
 0x311   :  { %v876_v52 = vadd.f32 %v1089_v38, %v875_v50 }
 0x313   :  { %908 = vst [vmem:[%s1499_s7 + $0x28] sm:$0xff] %v876_v52 }
 0x318   :  { %v878_v54 = vpop.f32.mrf.mxu3 }
 0x319   :  { %v879_v4 = vadd.f32 %v1089_v38, %v878_v54 }
 0x31b   :  { %909 = vst [vmem:[%s1499_s7 + $0x30] sm:$0xff] %v879_v4 }
 0x320   :  { %v880_v58 = vpop.f32.mrf.mxu3 }
 0x321   :  { %v881_v59 = vadd.f32 %v1089_v38, %v880_v58 }
 0x323   :  { %910 = vst [vmem:[%s1499_s7 + $0x38] sm:$0xff] %v881_v59 }
 0x328   :  { %v883_v60 = vpop.f32.mrf.mxu3 }
 0x329   :  { %v884_v6 = vadd.f32 %v1089_v38, %v883_v60 }
 0x32b   :  { %911 = vst [vmem:[%s1499_s7 + $0x40] sm:$0xff] %v884_v6 }
 0x330   :  { %v885_v62 = vpop.f32.mrf.mxu3 }
 0x331   :  { %v886_v63 = vadd.f32 %v1089_v38, %v885_v62 }
 0x333   :  { %912 = vst [vmem:[%s1499_s7 + $0x48] sm:$0xff] %v886_v63 }
 0x338   :  { %v888_v0 = vpop.f32.mrf.mxu3 }
 0x339   :  { %v889_v45 = vadd.f32 %v1089_v38, %v888_v0 }
 0x33b   :  { %913 = vst [vmem:[%s1499_s7 + $0x50] sm:$0xff] %v889_v45 }
 0x340   :  { %v890_v61 = vpop.f32.mrf.mxu3 }
 0x341   :  { %v891_v16 = vadd.f32 %v1089_v38, %v890_v61 }
 0x343   :  { %914 = vst [vmem:[%s1499_s7 + $0x58] sm:$0xff] %v891_v16 }
 0x348   :  { %v893_v18 = vpop.f32.mrf.mxu3 }
 0x349   :  { %v894_v21 = vadd.f32 %v1089_v38, %v893_v18 }
 0x34b   :  { %915 = vst [vmem:[%s1499_s7 + $0x60] sm:$0xff] %v894_v21 }
 0x350   :  { %v895_v27 = vpop.f32.mrf.mxu3 }
 0x351   :  { %v896_v28 = vadd.f32 %v1089_v38, %v895_v27 }
 0x353   :  { %916 = vst [vmem:[%s1499_s7 + $0x68] sm:$0xff] %v896_v28 }
 0x358   :  { %v898_v20 = vpop.f32.mrf.mxu3 }
 0x359   :  { %v899_v29 = vadd.f32 %v1089_v38, %v898_v20 }
 0x35b   :  { %917 = vst [vmem:[%s1499_s7 + $0x70] sm:$0xff] %v899_v29 }
 0x360   :  { %v900_v30 = vpop.f32.mrf.mxu3 }
 0x361   :  { %v901_v35 = vadd.f32 %v1089_v38, %v900_v30 }
 0x363   :  { %918 = vst [vmem:[%s1499_s7 + $0x78] sm:$0xff] %v901_v35 }

</bundles_post_ra>
